<compile_context>
chip_gen: v7x
topology: tpu7x:2x2x1
jax: 0.10.0
libtpu: 0.0.40
codegen_flags: <defaults>
</compile_context>

<pallas_src>
import jax
import jax.numpy as jnp
from jax.experimental import pallas as pl
from jax.experimental.pallas import tpu as pltpu


def _identity_kernel(x_ref, o_ref):
    # Whole-tile load/store; elementwise copy is the degenerate "forward".
    o_ref[...] = x_ref[...]


def base_model_forward(x: jax.Array) -> jax.Array:
    """Pass-through forward of BaseModel implemented as a Pallas kernel.

    Accepts any shape (the PyTorch base class does not constrain it); the
    demo uses NCHW (B, C, H, W).  Returns an array identical to x.
    """
    orig_shape = x.shape
    total = x.size
    if total == 0:
        return x

    itemsize = jnp.dtype(x.dtype).itemsize

    # ---- lane-dense 2-D layout -------------------------------------------
    # Last dim maps to the 128-wide lane axis.  Prefer a wide (512) lane dim;
    # shrink for tiny tensors so we still end up with >= 2 row blocks of 8
    # sublanes each (keeps both v7x TensorCores fed, sublane dim stays a
    # multiple of 8).
    lane = 512
    while lane > 128 and total < 2 * 8 * lane:
        lane //= 2

    rows_unpadded = pl.cdiv(total, lane)

    # Row tile: largest power-of-two <= 1024 that still leaves >= 2 grid
    # blocks (>= 4 for larger inputs).  Never below 8 (sublane multiple).
    # Max tile = 1024 x 512 f32 = 2 MiB; double-buffered in + out = 8 MiB,
    # comfortably inside the 32 MiB scoped VMEM budget on v7x (64 MiB phys).
    tr = 8
    while tr < 1024 and tr * 4 <= rows_unpadded:
        tr *= 2

    # Pad the flat data so it tiles exactly: every grid step is a full tile,
    # no masked partial rows and no pathological 1-row blocks.
    rows = pl.cdiv(rows_unpadded, tr) * tr
    padded = rows * lane
    flat = x.reshape(-1)
    if padded != total:
        flat = jnp.pad(flat, (0, padded - total))
    x2d = flat.reshape(rows, lane)

    grid = (rows // tr,)

    out2d = pl.pallas_call(
        _identity_kernel,
        out_shape=jax.ShapeDtypeStruct((rows, lane), x.dtype),
        grid_spec=pltpu.PrefetchScalarGridSpec(
            num_scalar_prefetch=0,
            grid=grid,
            in_specs=[pl.BlockSpec((tr, lane), lambda i: (i, 0))],
            out_specs=pl.BlockSpec((tr, lane), lambda i: (i, 0)),
        ),
        compiler_params=pltpu.CompilerParams(
            dimension_semantics=("parallel",),
        ),
        # Pure-bandwidth op: zero flops, 2x bytes over HBM (read + write).
        cost_estimate=pl.CostEstimate(
            flops=0,
            transcendentals=0,
            bytes_accessed=2 * padded * itemsize,
        ),
        # Identity: let XLA alias the output buffer to the input buffer so
        # no extra HBM allocation (and, under donation, no round trip).
        input_output_aliases={0: 0},
    )(x2d)

    out_flat = out2d.reshape(-1)
    if padded != total:
        out_flat = out_flat[:total]
    return out_flat.reshape(orig_shape)


def summary() -> int:
    """Mirror of BaseModel.summary(): count of trainable parameters (= 0)."""
    params = 0  # BaseModel.__init__ registers no parameters.
    print(f"Trainable parameters: {params}")
    return params


if __name__ == "__main__":
    key = jax.random.PRNGKey(0)
    # Small NCHW input consistent with a conv-style model: batch=2, C=4, 16x16.
    x = jax.random.normal(key, (2, 4, 16, 16), dtype=jnp.float32)

    fwd = jax.jit(base_model_forward)
    y = fwd(x)
    y = jax.block_until_ready(y)

    assert y.shape == x.shape and y.dtype == x.dtype
    assert bool(jnp.array_equal(y, x))

    summary()
    print("KERNEL_OK")
</pallas_src>

<mosaic_0001>
module attributes {stable_mosaic.version = 11 : i64} {
  func.func @_identity_kernel(%arg0: i32, %arg1: memref<8x128xf32, #tpu.memory_space<vmem>>, %arg2: memref<8x128xf32, #tpu.memory_space<vmem>>) attributes {dimension_semantics = [#tpu.dimension_semantics<parallel>], iteration_bounds = array<i64: 2>, scalar_prefetch = 0 : i64, scratch_operands = 0 : i64, tpu.core_type = #tpu.core_type<tc>, window_params = [{transform_indices = @transform_0, window_bounds = array<i64: 8, 128>}, {transform_indices = @transform_1, window_bounds = array<i64: 8, 128>}]} {
    %c0 = arith.constant 0 : index
    %c0_0 = arith.constant 0 : index
    %0 = vector.load %arg1[%c0, %c0_0] : memref<8x128xf32, #tpu.memory_space<vmem>>, vector<8x128xf32>
    %c0_1 = arith.constant 0 : index
    %c0_2 = arith.constant 0 : index
    %1 = vector.load %arg2[%c0_1, %c0_2] : memref<8x128xf32, #tpu.memory_space<vmem>>, vector<8x128xf32>
    tpu.vector_store %arg2[%c0_1, %c0_2], %0 {strides = array<i32>} : memref<8x128xf32, #tpu.memory_space<vmem>>, vector<8x128xf32>,
    return
  }
  func.func @transform_0(%arg0: i32) -> (i32, i32) {
    %c0_i32 = arith.constant 0 : i32
    %c0_i32_0 = arith.constant 0 : i32
    return %arg0, %c0_i32 : i32, i32
  }
  func.func @transform_1(%arg0: i32) -> (i32, i32) {
    %c0_i32 = arith.constant 0 : i32
    %c0_i32_0 = arith.constant 0 : i32
    return %arg0, %c0_i32 : i32, i32
  }
}

</mosaic_0001>

<bundles_post_ra>
// kernel: base_model_forward.1
= control target key start
LH: loop header
LB: loop body
LE: loop exit
PB: predicated region body
PF: predicated region fallthrough
CT: control target
= control target key end

     0   :  { %s188_s6 = smov 0   ;;  %s208_s0 = inlined_call_operand.vmem [shape: f32[16,128], index: 0, kind: input, shape index: {}, may-alias: {0,1}]   ;;  %s209_s1 = inlined_call_operand.vmem [shape: f32[16,128], index: 1, kind: output, shape index: {}, may-alias: {0,1}]  }
   0x1 LB: > { %s167_s7 = sadd.s32 4294967295, %s190_s6   ;;  %p171_p0 = scmp.ge.s32.totalorder %s190_s6, 1  ;;  %s190_s6 = sphi %s188_s6, %s11_s6  }
   0x2   : > { %p86_p1 = scmp.lt.s32.totalorder %s190_s6, 3 }
   0x4   : > { %p87_p2 = pnand %p171_p0, %p86_p1 }
   0x5   : > { %p104_p3 = scmp.lt.s32.totalorder (!%p87_p2), %s167_s7, 1 }
   0x6   : > { %90 = sbr.rel (%p87_p2) target bundleno = 18 (0x12), region = 24 }
   0xd   : > { %s211_s7 = smov (!%p104_p3, %s167_s7), 1 }
   0xe   : > { %s172_s8 = sshll.u32 %s211_s7, 3 }
   0xf   : > { %s107_s11 = scalar_lea.vmem %s208_s0, %s172_s8  ;;  %s111_s14 = scalar_lea.vmem %s209_s1, %s172_s8 }
  0x10   : > { %v112_v0 = vld [vmem:[%s107_s11] sm:$0xff] }
  0x11   : > { %113 = vst [vmem:[%s111_s14] sm:$0xff] %v112_v0 }
  0x12 PF: > { %s11_s6 = sadd.s32 1, %s190_s6  }
  0x13   : > { %p8_p4 = scmp.ge.s32.totalorder %s11_s6, 4  }
  0x15   :  { %10 = sbr.rel (!%p8_p4) target bundleno = 1 (0x1), region = 54 }

</bundles_post_ra>
